<compile_context>
chip_gen: v5e
topology: v5e:2x2
jax: 0.10.0
libtpu: 0.0.40
codegen_flags: <defaults>
</compile_context>

<pallas_src>
import functools

import jax
import jax.numpy as jnp
from jax import lax
from jax.experimental import pallas as pl
from jax.experimental.pallas import tpu as pltpu


_N_CORES = 2  # v7x has 2 TensorCores per chip; the extra grid axis is a
              # harmless serial loop on single-core chips (v5e/v6e).


def _ls_ce_kernel(x_ref, tgt_ref, out_ref, acc_ref, *,
                  confidence, smoothing, n_valid, tile_n, steps_per_core,
                  use_mxu_reductions):
    core = pl.program_id(0)
    step = pl.program_id(1)

    # Per-core resident accumulator: zero it at the start of this core's sweep.
    @pl.when(step == 0)
    def _():
        acc_ref[...] = jnp.zeros_like(acc_ref)

    x = x_ref[...].astype(jnp.float32)          # (TN, C)
    tgt = tgt_ref[...]                          # (TN, 1) int32
    tn, c = x.shape

    if use_mxu_reductions:
        # The MXU is otherwise idle in this kernel; offload the lane reductions
        # to it so the XLU / vector-extended slot is not the binding unit.
        ones_c = jnp.ones((c, 1), jnp.float32)

        def row_sum(m):
            return jnp.dot(m, ones_c, preferred_element_type=jnp.float32)
    else:
        def row_sum(m):
            return jnp.sum(m, axis=-1, keepdims=True)

    # Numerically-stable log-sum-exp pieces of log_softmax.
    # Only the row max stays on the VPU/XLU path.
    row_max = jnp.max(x, axis=-1, keepdims=True)                      # (TN, 1)
    lse = jnp.log(row_sum(jnp.exp(x - row_max)))                      # (TN, 1)

    # weighted = (smoothing/C) * sum_j x[i,j] + confidence * x[i, target[i]]
    # computed without materializing a (TN, C) weights array.
    col_ids = lax.broadcasted_iota(jnp.int32, (tn, c), 1)
    tgt_sum = row_sum(jnp.where(col_ids == tgt, x, 0.0))              # (TN, 1)
    weighted = (smoothing / c) * row_sum(x) + confidence * tgt_sum    # (TN, 1)

    loss = lse + row_max - weighted                                   # (TN, 1)

    # Mask host-padded tail rows.  Padding rows are finite zeros, so no
    # per-element sanitize of x is needed; masking the per-row loss suffices.
    block_idx = core * steps_per_core + step
    row_ids = block_idx * tile_n + lax.broadcasted_iota(jnp.int32, (tn, 1), 0)
    acc_ref[...] += jnp.where(row_ids < n_valid, loss, 0.0)

    # Single cross-lane reduction per core, on the last step only.
    @pl.when(step == steps_per_core - 1)
    def _():
        out_ref[...] = jnp.sum(acc_ref[...]).reshape(1, 1, 1)


def _round_up(v, m):
    return ((v + m - 1) // m) * m


def _vmem_limit_bytes():
    # Physical VMEM: v5e/v6e 128 MiB per core, v7x 64 MiB per core.
    # Leave headroom below physical capacity; never below the 48 MiB that the
    # tile budget assumes (safe fallback for v7x).
    cap = 64 * 1024 * 1024
    try:
        cap = int(pltpu.get_tpu_info().vmem_capacity_bytes)
    except Exception:
        pass
    return int(min(max(48 * 1024 * 1024, (cap * 3) // 4), 96 * 1024 * 1024))


def _default_tile_n(rows_per_core, c, itemsize, vmem_limit):
    # Honest per-tile-row working set: 2x double-buffered input rows plus ~4
    # full-width 4-byte intermediates (f32 cast of x, exp(x - max), the int32
    # column iota, and the one-hot-masked x).
    per_row = 2 * c * itemsize + 4 * c * 4
    budget = max(4 * 1024 * 1024, vmem_limit - 8 * 1024 * 1024)
    t = budget // max(1, per_row)
    t = max(8, min(4096, (t // 8) * 8))
    return min(t, _round_up(max(1, rows_per_core), 8))


def label_smoothing_cross_entropy(x, target, smoothing=0.1, tile_n=None,
                                  use_mxu_reductions=True):
    n, c = x.shape
    confidence = 1.0 - smoothing
    vmem_limit = _vmem_limit_bytes()

    rows_per_core = (n + _N_CORES - 1) // _N_CORES
    if tile_n is None:
        tile_n = _default_tile_n(rows_per_core, c,
                                 jnp.dtype(x.dtype).itemsize, vmem_limit)
    tile_n = max(8, (int(tile_n) // 8) * 8)
    tile_n = min(tile_n, _round_up(rows_per_core, 8))

    steps_per_core = (n + _N_CORES * tile_n - 1) // (_N_CORES * tile_n)
    n_pad = _N_CORES * steps_per_core * tile_n

    # Pad the batch so every block's DMA is fully in-bounds and the 2-core
    # split is rectangular; pad rows are finite zeros and are masked out of
    # the loss inside the kernel.
    # TODO(synk): this copies x once when N % (2*tile_n) != 0; an in-kernel
    # tail branch (lax.cond) would avoid that copy at the cost of a per-step
    # conditional.
    if n_pad != n:
        x = jnp.pad(x, ((0, n_pad - n), (0, 0)))
        target = jnp.pad(target, (0, n_pad - n))
    tgt2d = target.astype(jnp.int32).reshape(n_pad, 1)

    kernel = functools.partial(
        _ls_ce_kernel,
        confidence=float(confidence),     # plain Python floats: compile-time
        smoothing=float(smoothing),       #   constants, no captured tracers
        n_valid=int(n),
        tile_n=int(tile_n),
        steps_per_core=int(steps_per_core),
        use_mxu_reductions=bool(use_mxu_reductions),
    )

    # TODO(synk): for C < 128 only C/128 of each lane/vreg (and of every load
    # and reduction) is used; folding rows into the lane dimension would need
    # a different target-gather scheme.
    partials = pl.pallas_call(
        kernel,
        out_shape=jax.ShapeDtypeStruct((_N_CORES, 1, 1), jnp.float32),
        grid=(_N_CORES, steps_per_core),
        in_specs=[
            pl.BlockSpec((tile_n, c),
                         lambda core, i: (core * steps_per_core + i, 0)),
            pl.BlockSpec((tile_n, 1),
                         lambda core, i: (core * steps_per_core + i, 0)),
        ],
        # One partial-sum block per core; same block across the inner
        # (reduction) axis, written once on its last step.
        out_specs=pl.BlockSpec((1, 1, 1), lambda core, i: (core, 0, 0)),
        scratch_shapes=[pltpu.VMEM((tile_n, 1), jnp.float32)],
        compiler_params=pltpu.CompilerParams(
            dimension_semantics=("parallel", "arbitrary"),
            vmem_limit_bytes=vmem_limit,
        ),
    )(x, tgt2d)

    # Combine the per-core partial sums and fold in the batch mean.
    return jnp.sum(partials) / n


def _reference(x, target, smoothing=0.1):
    # Pure-JAX reference mirroring the PyTorch module.
    logprobs = jax.nn.log_softmax(x.astype(jnp.float32), axis=-1)
    nll = -jnp.take_along_axis(logprobs, target[:, None], axis=-1)[:, 0]
    smooth = -jnp.mean(logprobs, axis=-1)
    loss = (1.0 - smoothing) * nll + smoothing * smooth
    return jnp.mean(loss)


if __name__ == "__main__":
    key = jax.random.PRNGKey(0)
    kx, kt = jax.random.split(key)

    # Small demo shapes consistent with the module: batch=16 logits, 32 classes.
    N, C = 16, 32
    x = jax.random.normal(kx, (N, C), dtype=jnp.float32)
    target = jax.random.randint(kt, (N,), 0, C, dtype=jnp.int32)

    # Default path: dual-core split + MXU-offloaded row sums.  (MXU f32 sums
    # may use reduced-precision passes, hence the looser tolerance here.)
    loss = jax.block_until_ready(
        label_smoothing_cross_entropy(x, target, smoothing=0.1))
    ref = _reference(x, target, smoothing=0.1)
    assert jnp.allclose(loss, ref, atol=1e-2, rtol=1e-2), (loss, ref)

    # Non-divisible batch (host-pad tail path) with pure VPU/XLU reductions;
    # this path is numerically exact vs. the f32 reference.
    N2 = 13
    x2 = jax.random.normal(kx, (N2, C), dtype=jnp.float32)
    t2 = jax.random.randint(kt, (N2,), 0, C, dtype=jnp.int32)
    loss2 = jax.block_until_ready(
        label_smoothing_cross_entropy(x2, t2, smoothing=0.1, tile_n=8,
                                      use_mxu_reductions=False))
    ref2 = _reference(x2, t2, smoothing=0.1)
    assert jnp.allclose(loss2, ref2, atol=1e-5, rtol=1e-5), (loss2, ref2)

    print("KERNEL_OK")
</pallas_src>

<mosaic_0001>
module attributes {stable_mosaic.version = 11 : i64} {
  func.func @_ls_ce_kernel(%arg0: i32, %arg1: i32, %arg2: memref<8x32xf32, #tpu.memory_space<vmem>>, %arg3: memref<8x1xi32, #tpu.memory_space<vmem>>, %arg4: memref<1x1x1xf32, #tpu.memory_space<vmem>>, %arg5: memref<8x1xf32, #tpu.memory_space<vmem>>) attributes {dimension_semantics = [#tpu.dimension_semantics<parallel>, #tpu.dimension_semantics<arbitrary>], iteration_bounds = array<i64: 2, 1>, scalar_prefetch = 0 : i64, scratch_operands = 1 : i64, tpu.core_type = #tpu.core_type<tc>, window_params = [{transform_indices = @transform_0, window_bounds = array<i64: 8, 32>}, {transform_indices = @transform_1, window_bounds = array<i64: 8, 1>}, {transform_indices = @transform_2, window_bounds = array<i64: 1, 1, 1>}]} {
    %c0_i32 = arith.constant 0 : i32
    %0 = arith.cmpi eq, %arg1, %c0_i32 : i32
    %1 = arith.extui %0 : i1 to i32
    %c0_i32_0 = arith.constant 0 : i32
    %2 = arith.cmpi ne, %1, %c0_i32_0 : i32
    scf.if %2 {
      %cst_18 = arith.constant 0.000000e+00 : f32
      %43 = vector.broadcast %cst_18 : f32 to vector<8x1xf32>
      %c0_19 = arith.constant 0 : index
      %c0_20 = arith.constant 0 : index
      %44 = vector.load %arg5[%c0_19, %c0_20] : memref<8x1xf32, #tpu.memory_space<vmem>>, vector<8x1xf32>
      tpu.vector_store %arg5[%c0_19, %c0_20], %43 {strides = array<i32>} : memref<8x1xf32, #tpu.memory_space<vmem>>, vector<8x1xf32>,
    } else {
    }
    %c0 = arith.constant 0 : index
    %c0_1 = arith.constant 0 : index
    %3 = vector.load %arg2[%c0, %c0_1] : memref<8x32xf32, #tpu.memory_space<vmem>>, vector<8x32xf32>
    %c0_2 = arith.constant 0 : index
    %c0_3 = arith.constant 0 : index
    %4 = vector.load %arg3[%c0_2, %c0_3] : memref<8x1xi32, #tpu.memory_space<vmem>>, vector<8x1xi32>
    %cst = arith.constant 1.000000e+00 : f32
    %5 = vector.broadcast %cst : f32 to vector<32x1xf32>
    %cst_4 = arith.constant dense<0xFF800000> : vector<8xf32>
    %6 = vector.multi_reduction <maximumf>, %3, %cst_4 [1] : vector<8x32xf32> to vector<8xf32>
    %7 = vector.shape_cast %6 : vector<8xf32> to vector<8x1xf32>
    %8 = vector.broadcast %7 : vector<8x1xf32> to vector<8x32xf32>
    %9 = arith.subf %3, %8 : vector<8x32xf32>
    %10 = math.exp %9 : vector<8x32xf32>
    %cst_5 = arith.constant dense<0.000000e+00> : vector<8x1xf32>
    %11 = tpu.matmul %10, %5, %cst_5 {dimension_numbers = #tpu.dot_dimension_numbers<[1], [0], [0], [1], [0, 0, 1, 1], [], []>} : vector<8x32xf32>, vector<32x1xf32>, vector<8x1xf32> -> vector<8x1xf32>
    %12 = math.log %11 : vector<8x1xf32>
    %13 = tpu.iota {dimensions = array<i32: 1>} : vector<8x32xi32>
    %14 = vector.broadcast %4 : vector<8x1xi32> to vector<8x32xi32>
    %15 = arith.cmpi eq, %13, %14 : vector<8x32xi32>
    %cst_6 = arith.constant 0.000000e+00 : f32
    %16 = vector.broadcast %cst_6 : f32 to vector<8x32xf32>
    %17 = arith.select %15, %3, %16 : vector<8x32xi1>, vector<8x32xf32>
    %cst_7 = arith.constant dense<0.000000e+00> : vector<8x1xf32>
    %18 = tpu.matmul %17, %5, %cst_7 {dimension_numbers = #tpu.dot_dimension_numbers<[1], [0], [0], [1], [0, 0, 1, 1], [], []>} : vector<8x32xf32>, vector<32x1xf32>, vector<8x1xf32> -> vector<8x1xf32>
    %cst_8 = arith.constant dense<0.000000e+00> : vector<8x1xf32>
    %19 = tpu.matmul %3, %5, %cst_8 {dimension_numbers = #tpu.dot_dimension_numbers<[1], [0], [0], [1], [0, 0, 1, 1], [], []>} : vector<8x32xf32>, vector<32x1xf32>, vector<8x1xf32> -> vector<8x1xf32>
    %cst_9 = arith.constant 3.125000e-03 : f32
    %20 = vector.broadcast %cst_9 : f32 to vector<8x1xf32>
    %21 = arith.mulf %20, %19 : vector<8x1xf32>
    %cst_10 = arith.constant 0.899999976 : f32
    %22 = vector.broadcast %cst_10 : f32 to vector<8x1xf32>
    %23 = arith.mulf %22, %18 : vector<8x1xf32>
    %24 = arith.addf %21, %23 : vector<8x1xf32>
    %25 = arith.addf %12, %7 : vector<8x1xf32>
    %26 = arith.subf %25, %24 : vector<8x1xf32>
    %c1_i32 = arith.constant 1 : i32
    %27 = arith.muli %arg0, %c1_i32 : i32
    %28 = arith.addi %27, %arg1 : i32
    %c8_i32 = arith.constant 8 : i32
    %29 = arith.muli %28, %c8_i32 : i32
    %30 = tpu.iota {dimensions = array<i32: 0>} : vector<8x1xi32>
    %31 = vector.broadcast %29 : i32 to vector<8x1xi32>
    %32 = arith.addi %31, %30 : vector<8x1xi32>
    %c0_11 = arith.constant 0 : index
    %c0_12 = arith.constant 0 : index
    %33 = vector.load %arg5[%c0_11, %c0_12] : memref<8x1xf32, #tpu.memory_space<vmem>>, vector<8x1xf32>
    %c16_i32 = arith.constant 16 : i32
    %34 = vector.broadcast %c16_i32 : i32 to vector<8x1xi32>
    %35 = arith.cmpi slt, %32, %34 : vector<8x1xi32>
    %cst_13 = arith.constant 0.000000e+00 : f32
    %36 = vector.broadcast %cst_13 : f32 to vector<8x1xf32>
    %37 = arith.select %35, %26, %36 : vector<8x1xi1>, vector<8x1xf32>
    %38 = arith.addf %33, %37 : vector<8x1xf32>
    %c0_14 = arith.constant 0 : index
    %c0_15 = arith.constant 0 : index
    %39 = vector.load %arg5[%c0_14, %c0_15] : memref<8x1xf32, #tpu.memory_space<vmem>>, vector<8x1xf32>
    tpu.vector_store %arg5[%c0_14, %c0_15], %38 {strides = array<i32>} : memref<8x1xf32, #tpu.memory_space<vmem>>, vector<8x1xf32>,
    %c0_i32_16 = arith.constant 0 : i32
    %40 = arith.cmpi eq, %arg1, %c0_i32_16 : i32
    %41 = arith.extui %40 : i1 to i32
    %c0_i32_17 = arith.constant 0 : i32
    %42 = arith.cmpi ne, %41, %c0_i32_17 : i32
    scf.if %42 {
      %c0_18 = arith.constant 0 : index
      %c0_19 = arith.constant 0 : index
      %43 = vector.load %arg5[%c0_18, %c0_19] : memref<8x1xf32, #tpu.memory_space<vmem>>, vector<8x1xf32>
      %44 = vector.shape_cast %43 : vector<8x1xf32> to vector<1x8x1xf32>
      %cst_20 = arith.constant dense<0.000000e+00> : vector<1xf32>
      %45 = vector.multi_reduction <add>, %44, %cst_20 [1, 2] : vector<1x8x1xf32> to vector<1xf32>
      %46 = vector.shape_cast %45 : vector<1xf32> to vector<1x1x1xf32>
      %47 = vector.extract %46[0, 0, 0] : f32 from vector<1x1x1xf32>
      %48 = vector.broadcast %47 : f32 to vector<1x1x1xf32>
      %c0_21 = arith.constant 0 : index
      %c0_22 = arith.constant 0 : index
      %c0_23 = arith.constant 0 : index
      %49 = vector.load %arg4[%c0_21, %c0_22, %c0_23] : memref<1x1x1xf32, #tpu.memory_space<vmem>>, vector<1x1x1xf32>
      tpu.vector_store %arg4[%c0_21, %c0_22, %c0_23], %48 {strides = array<i32>} : memref<1x1x1xf32, #tpu.memory_space<vmem>>, vector<1x1x1xf32>,
    } else {
    }
    return
  }
  func.func @transform_0(%arg0: i32, %arg1: i32) -> (i32, i32) {
    %c1_i32 = arith.constant 1 : i32
    %0 = arith.muli %arg0, %c1_i32 : i32
    %1 = arith.addi %0, %arg1 : i32
    %c0_i32 = arith.constant 0 : i32
    %c0_i32_0 = arith.constant 0 : i32
    return %1, %c0_i32 : i32, i32
  }
  func.func @transform_1(%arg0: i32, %arg1: i32) -> (i32, i32) {
    %c1_i32 = arith.constant 1 : i32
    %0 = arith.muli %arg0, %c1_i32 : i32
    %1 = arith.addi %0, %arg1 : i32
    %c0_i32 = arith.constant 0 : i32
    %c0_i32_0 = arith.constant 0 : i32
    return %1, %c0_i32 : i32, i32
  }
  func.func @transform_2(%arg0: i32, %arg1: i32) -> (i32, i32, i32) {
    %c0_i32 = arith.constant 0 : i32
    %c0_i32_0 = arith.constant 0 : i32
    %c0_i32_1 = arith.constant 0 : i32
    return %arg0, %c0_i32, %c0_i32_0 : i32, i32, i32
  }
}

</mosaic_0001>

<bundles_post_ra>
// kernel: tpu_custom_call.1
= control target key start
LH: loop header
LB: loop body
LE: loop exit
PB: predicated region body
PF: predicated region fallthrough
CT: control target
= control target key end

     0   :  { %s463_s9 = smov 0   ;;  %s465_s10 = smov 0   ;;  %s515_s0 = inlined_call_operand.vmem [shape: f32[16,32], index: 0, kind: input, shape index: {}]   ;;  %s516_s1 = inlined_call_operand.vmem [shape: s32[16,1], index: 1, kind: input, shape index: {}]   ;;  %s517_s2 = inlined_call_operand.vmem [shape: f32[2,1,1], index: 2, kind: output, shape index: {}]  }
   0x1   :  { %s467_s11 = smov 0  }
   0x2 LB: > { %s24_s12 = sadd.s32 1, %s439_s10  ;;  %p378_p0 = scmp.ge.s32.totalorder %s443_s11, 1  ;;  %s443_s11 = sphi %s467_s11, %s12_s11   ;;  %s439_s10 = sphi %s465_s10, %s519_s10   ;;  %s435_s9 = sphi %s463_s9, %s518_s9  }
   0x3   : > { %p26_p1 = scmp.ge.s32.totalorder %s24_s12, 2  ;;  %p140_p2 = scmp.lt.s32.totalorder %s443_s11, 3 }
   0x5   : > { %s521_s12 = smov (%p26_p1, %s24_s12), 0  ;;  %p141_p3 = pnand %p378_p0, %p140_p2 }
   0x6   : > { %p166_p4 = scmp.lt.s32.totalorder (!%p141_p3), %s435_s9, 1  ;;  %s384_s21 = sshll.u32 (!%p141_p3), %s435_s9, 3 }
   0x7   : > { %144 = sbr.rel (%p141_p3) target bundleno = 479 (0x1df), region = 28 }
   0xc   : > { %v445_v0 = vmov 0   ;;  %s485_s13 = scalar_select %p166_p4, %s435_s9, 1  ;;  %vm188_vm0 = vcmask 261120   ;;  %v446_v4 = vmov 1.0   ;;  %v220_v9 = vlaneseq }
   0xd   : > { %416 = vset.pattern.permute.xlu0 %v445_v0  ;;  %210 = vmatpush.msra.mxu0 %v446_v4  ;;  %vm184_vm2 = vcmask 7168   ;;  %v447_v13 = vmov 0.0   ;;  %v282_v18 = vstv %s384_s21  ;;  %vm305_vm4 = vcmask 0  }
   0xe   : > { %s379_s14 = sshll.u32 %s485_s13, 3  ;;  %265 = vmatpush.msra.mxu2 %v446_v4  ;;  %242 = vmatpush.msra.mxu1 %v446_v4  ;;  %v221_v10 = vand.u32 127, %v220_v9  ;;  %185 = vst.msk [vmem:[#allocation2] sm:$0xff] %vm184_vm2, %v447_v13  ;;  %v281_v15 = vshrl.u32 %v220_v9, 7  ;;  %s179_s24 = scalar_lea.vmem %s517_s2, %s485_s13 }
   0xf   : > { %s169_s17 = scalar_lea.vmem %s515_s0, %s379_s14  ;;  %s175_s20 = scalar_lea.vmem %s516_s1, %s379_s14  ;;  %211 = vmatpush.msra.mxu0 %v446_v4 }
  0x10   : > { %v186_v1 = vld [vmem:[%s169_s17] sm:$0xff]  ;;  %266 = vmatpush.msra.mxu2 %v446_v4  ;;  %243 = vmatpush.msra.mxu1 %v446_v4  ;;  %v283_v22 = vadd.s32 %v282_v18, %v281_v15 }
  0x11   : > { %v189_v2 = vsel %vm188_vm0, %v186_v1, -inf  ;;  %v187_v3 = vld [vmem:[%s175_s20] sm:$0xff]  ;;  %212 = vmatpush.msra.mxu0 %v446_v4 }
  0x12   : > { %190 = vmax.xlane.f32.xlu0 %v189_v2  ;;  %267 = vmatpush.msra.mxu2 %v446_v4  ;;  %vm285_vm3 = vcmp.lt.s32.totalorder %v283_v22, 16 }
  0x13   : > { %244 = vmatpush.msra.mxu1 %v446_v4  ;;  %213 = vmatpush.msra.mxu0 %v446_v4 }
  0x14   : > { %268 = vmatpush.msra.mxu2 %v446_v4 }
  0x15   : > { %383 = vmatmul.msk.f32.vlgmr.msra.gmra.mxu2 %vm188_vm0, %v186_v1  ;;  %245 = vmatpush.msra.mxu1 %v446_v4  ;;  %v284_v27 = vld [vmem:[#allocation2] sm:$0xff] }
  0x26   : > { %223 = vperm.xlu0 %416, %v187_v3  }
  0x85   : > { %v191_v5 = vpop.xlane.xlu0 %190 }
  0x86   : > { %v192_v6 = vsub.f32 %v186_v1, %v191_v5 }
  0x88   : > { %v193_v7 = vmul.f32 1.442695, %v192_v6 }
  0x8a   : > { %417 = vpow2.f32 %v193_v7 }
  0x90   : > { %v418_v8 = vpop.eup %417 }
  0x91   : > { %381 = vmatmul.msk.f32.vlgmr.msra.gmra.mxu0 %vm188_vm0, %v418_v8 }
  0x98   : > { %v224_v11 = vpop.permute.xlu0 %223  ;;  %v270_v16 = vpop.f32.mrf.mxu2 }
  0x99   : > { %vm225_vm1 = vcmp.eq.s32.totalorder %v221_v10, %v224_v11  ;;  %v273_v20 = vmul.f32 0.003125, %v270_v16 }
  0x9a   : > { %v226_v12 = vsel %vm225_vm1, %v186_v1, 0.0 }
  0x9b   : > { %382 = vmatmul.msk.f32.vlgmr.msra.gmra.mxu1 %vm188_vm0, %v226_v12 }
 0x10e   : > { %v215_v14 = vpop.f32.mrf.mxu0 }
 0x10f   : > { %419 = vlog2.f32 %v215_v14 }
 0x115   : > { %v420_v17 = vpop.eup %419 }
 0x116   : > { %v219_v19 = vmul.f32 0.6931472, %v420_v17 }
 0x118   : > { %v247_v21 = vpop.f32.mrf.mxu1  ;;  %v276_v24 = vadd.f32 %v219_v19, %v191_v5 }
 0x119   : > { %v274_v23 = vmul.f32 0.9, %v247_v21 }
 0x11b   : > { %v275_v25 = vadd.f32 %v274_v23, %v273_v20 }
 0x11d   : > { %v277_v26 = vsub.f32 %v276_v24, %v275_v25 }
 0x11f   : > { %v286_v28 = vsel %vm285_vm3, %v277_v26, 0.0 }
 0x120   : > { %v287_v29 = vadd.f32 %v286_v28, %v284_v27 }
 0x122   : > { %289 = vst.msk [vmem:[#allocation2] sm:$0xff] %vm184_vm2, %v287_v29 }
 0x129   : > { %v293_v30 = vld [vmem:[#allocation2] sm:$0xff] }
 0x12a   : > { %v294_v31 = vsel %vm184_vm2, %v293_v30, 0.0 }
 0x12b   : > { %295 = vadd.xlane.f32.xlu1 %v294_v31 }
 0x19e   : > { %v296_v32 = vpop.xlane.xlu1 %295 }
 0x19f   : > { %v297_v33 = vrot.slane %v296_v32, 4 }
 0x1a1   : > { %v298_v34 = vadd.f32 %v297_v33, %v296_v32 }
 0x1a3   : > { %v299_v35 = vrot.slane %v298_v34, 2 }
 0x1a5   : > { %v300_v36 = vadd.f32 %v299_v35, %v298_v34 }
 0x1a7   : > { %v301_v37 = vrot.slane %v300_v36, 1 }
 0x1a9   : > { %v302_v38 = vadd.f32 %v301_v37, %v300_v36 }
 0x1ab   : > { %387 = vpush %v302_v38 }
 0x1dc   : > { %s388_s25 = spop %387 }
 0x1dd   : > { %v304_v39 = vstv %s388_s25 }
 0x1de   : > { %306 = vst.msk [vmem:[%s179_s24] sm:$0x1] %vm305_vm4, %v304_v39 }
 0x1df PF: > { %s12_s11 = sadd.s32 1, %s443_s11   ;;  %s518_s9 = smov %s439_s10 }
 0x1e0   : > { %p9_p5 = scmp.ge.s32.totalorder %s12_s11, 4   ;;  %s519_s10 = smov %s521_s12 }
 0x1e2   :  { %11 = sbr.rel (!%p9_p5) target bundleno = 2 (0x2), region = 69 }

</bundles_post_ra>
